<compile_context>
chip_gen: v5e
topology: v5e:2x2
jax: 0.10.0
libtpu: 0.0.40
codegen_flags: <defaults>
</compile_context>

<pallas_src>
import jax
import jax.numpy as jnp
from jax.experimental import pallas as pl
from jax.experimental.pallas import tpu as pltpu


def _round_up(v, m):
    return ((v + m - 1) // m) * m


def _mlp_kernel(xT_ref, w1_ref, b1_ref, w2_ref, b2_ref, w3_ref, b3_ref, out_ref):
    # x arrives f32; cast per-tile to the weight compute dtype (no-op for f32,
    # bf16 cast happens here on idle VPU slots instead of as a wrapper XLA op).
    xT = xT_ref[...].astype(w1_ref.dtype)                      # (in_dim, tb)

    # fc1 + relu (MXU matmul, f32 accumulation, f32 bias add / relu)
    h1 = jnp.dot(w1_ref[...], xT,
                 preferred_element_type=jnp.float32) + b1_ref[...]
    h1 = jnp.maximum(h1, 0.0)                                  # (h1, tb) f32

    # fc2 + relu
    h2 = jnp.dot(w2_ref[...], h1.astype(w2_ref.dtype),
                 preferred_element_type=jnp.float32) + b2_ref[...]
    h2 = jnp.maximum(h2, 0.0)                                  # (h2, tb) f32

    # fc3 (no activation); out rows are n_actions padded to 8 sublanes, lanes
    # are the batch -> full-lane, compact store.
    out_ref[...] = (
        jnp.dot(w3_ref[...], h2.astype(w3_ref.dtype),
                preferred_element_type=jnp.float32) + b3_ref[...]
    )


def prepare_params(params, *, use_bf16=False):
    """One-time kernel-ready parameter prep (hoisted out of the per-call path).

    params: PyTorch-layout dict: w* (out, in), b* (out,), all float32.
    Returns a dict of kernel-ready arrays:
      w1 (h1, in), w2 (h2, h1)      in compute dtype (f32 or bf16)
      w3 (8*k, h2)                  fc3 zero-padded to a multiple of 8 sublanes
      b1/b2/b3 column vectors (h, 1) kept f32 (bias add happens in f32)
    """
    w1, b1 = params["w1"], params["b1"]
    w2, b2 = params["w2"], params["b2"]
    w3, b3 = params["w3"], params["b3"]

    n_actions = int(w3.shape[0])
    n_out = _round_up(n_actions, 8)              # sublane padding only (tiny)
    w3p = jnp.zeros((n_out, w3.shape[1]), w3.dtype).at[:n_actions].set(w3)
    b3p = jnp.zeros((n_out,), b3.dtype).at[:n_actions].set(b3)

    cdt = jnp.bfloat16 if use_bf16 else jnp.float32
    return {
        "w1": w1.astype(cdt), "b1": b1.reshape(-1, 1).astype(jnp.float32),
        "w2": w2.astype(cdt), "b2": b2.reshape(-1, 1).astype(jnp.float32),
        "w3": w3p.astype(cdt), "b3": b3p.reshape(-1, 1).astype(jnp.float32),
        "n_actions": n_actions,
    }


def _choose_tb(B, block_b):
    """Lane-axis (batch) tile: multiple of 128 or the full batch; >=2 grid
    steps once B > 128 so both v7x TensorCores get work."""
    if B <= 128:
        return B
    tb = min(block_b, _round_up(pl.cdiv(B, 2), 128))
    tb = max(128, (tb // 128) * 128)
    return tb


def net_forward(x, kp, *, block_b=8192):
    """Run the fused MLP Pallas kernel.

    x:       (B, input_size) float32 observations
    kp:      output of prepare_params()
    block_b: max batch-lane tile size per grid step
    returns: (B, n_actions) float32
    """
    w1, b1 = kp["w1"], kp["b1"]
    w2, b2 = kp["w2"], kp["b2"]
    w3, b3 = kp["w3"], kp["b3"]
    n_actions = kp["n_actions"]

    B, in_dim = x.shape
    h1 = w1.shape[0]
    h2 = w2.shape[0]
    n_out = w3.shape[0]

    # Batch-in-lanes: feed x transposed (cheap layout op on a tiny row width);
    # the kernel then reads full-lane (in_dim, tb) tiles.
    xT = x.T                                                   # (in_dim, B) f32

    tb = _choose_tb(B, block_b)
    grid = (pl.cdiv(B, tb),)

    # Advisory cost estimate for XLA's scheduler.
    flops = 2 * B * (in_dim * h1 + h1 * h2 + h2 * n_out)
    wbytes = (w1.size * w1.dtype.itemsize + w2.size * w2.dtype.itemsize
              + w3.size * w3.dtype.itemsize
              + (b1.size + b2.size + b3.size) * 4)
    bytes_accessed = B * in_dim * 4 + B * n_out * 4 + wbytes
    cost = pl.CostEstimate(flops=flops, bytes_accessed=bytes_accessed,
                           transcendentals=0)

    resident = lambda shape: pl.BlockSpec(shape, lambda i: (0, 0))

    outT = pl.pallas_call(
        _mlp_kernel,
        out_shape=jax.ShapeDtypeStruct((n_out, B), jnp.float32),
        grid_spec=pltpu.PrefetchScalarGridSpec(
            num_scalar_prefetch=0,
            grid=grid,
            in_specs=[
                pl.BlockSpec((in_dim, tb), lambda i: (0, i)),  # x^T: batch-tiled lanes
                resident((h1, in_dim)),                        # w1
                resident((h1, 1)),                             # b1 (column)
                resident((h2, h1)),                            # w2
                resident((h2, 1)),                             # b2
                resident((n_out, h2)),                         # w3 (sublane-padded)
                resident((n_out, 1)),                          # b3
            ],
            out_specs=pl.BlockSpec((n_out, tb), lambda i: (0, i)),
        ),
        compiler_params=pltpu.CompilerParams(
            dimension_semantics=("parallel",),        # both TCs on v7x
            vmem_limit_bytes=32 * 1024 * 1024,        # tb=8192 uses ~5 MiB; safe on all gens
        ),
        cost_estimate=cost,
    )(xT, w1, b1, w2, b2, w3, b3)

    # Compact output: slice off the sublane padding and return (B, n_actions).
    return outT[:n_actions, :].T


def init_params(key, input_size, hid_1, hid_2, n_actions):
    """Deterministic init mirroring nn.Linear's default U(-1/sqrt(fan_in), ...).

    Stored in PyTorch-native layout: W (out, in), b (out,).
    """
    ks = jax.random.split(key, 6)

    def linear(kw, kb, fan_in, fan_out):
        bound = 1.0 / jnp.sqrt(jnp.float32(fan_in))
        w = jax.random.uniform(kw, (fan_out, fan_in), jnp.float32, -bound, bound)
        b = jax.random.uniform(kb, (fan_out,), jnp.float32, -bound, bound)
        return w, b

    w1, b1 = linear(ks[0], ks[1], input_size, hid_1)
    w2, b2 = linear(ks[2], ks[3], hid_1, hid_2)
    w3, b3 = linear(ks[4], ks[5], hid_2, n_actions)
    return {"w1": w1, "b1": b1, "w2": w2, "b2": b2, "w3": w3, "b3": b3}


def net_forward_ref(x, p):
    """Pure-JAX reference (PyTorch layout) for correctness checking."""
    h1 = jnp.maximum(x @ p["w1"].T + p["b1"], 0.0)
    h2 = jnp.maximum(h1 @ p["w2"].T + p["b2"], 0.0)
    return h2 @ p["w3"].T + p["b3"]


# TODO(synk): Adam optimizer / MSELoss / .to(device) in Net are training & host
# concerns, not part of the forward compute; not translated.

if __name__ == "__main__":
    # LunarLander-v2-like sizes, kept small.
    input_size = 8     # observation dim
    hid_1 = 32
    hid_2 = 32
    n_actions = 4

    key = jax.random.PRNGKey(0)
    k_params, k_x1, k_x2, k_x3 = jax.random.split(key, 4)
    params = init_params(k_params, input_size, hid_1, hid_2, n_actions)

    # One-time kernel-ready parameter prep (hoisted out of the call path).
    kp_f32 = prepare_params(params)
    kp_bf16 = prepare_params(params, use_bf16=True)

    # 1) small batch (single grid step), f32 path
    x_small = jax.random.normal(k_x1, (8, input_size), jnp.float32)
    out_small = jax.block_until_ready(net_forward(x_small, kp_f32))
    ref_small = net_forward_ref(x_small, params)
    assert out_small.shape == (8, n_actions)
    assert jnp.allclose(out_small, ref_small, atol=1e-4, rtol=1e-4), \
        "f32 small-batch mismatch vs JAX reference"

    # 2) gridded batch path: 4 grid steps of 128 batch lanes each
    x_big = jax.random.normal(k_x2, (512, input_size), jnp.float32)
    out_big = jax.block_until_ready(net_forward(x_big, kp_f32, block_b=128))
    ref_big = net_forward_ref(x_big, params)
    assert out_big.shape == (512, n_actions)
    assert jnp.allclose(out_big, ref_big, atol=1e-4, rtol=1e-4), \
        "f32 gridded-batch mismatch vs JAX reference"

    # 3) ragged batch (B not a multiple of the lane tile -> partial last block)
    x_rag = jax.random.normal(k_x3, (200, input_size), jnp.float32)
    out_rag = jax.block_until_ready(net_forward(x_rag, kp_f32, block_b=128))
    ref_rag = net_forward_ref(x_rag, params)
    assert out_rag.shape == (200, n_actions)
    assert jnp.allclose(out_rag, ref_rag, atol=1e-4, rtol=1e-4), \
        "f32 ragged-batch mismatch vs JAX reference"

    # 4) bf16 MXU-input path (weights bf16, x cast in-kernel, f32 accumulation)
    out_bf16 = jax.block_until_ready(net_forward(x_big, kp_bf16, block_b=128))
    assert jnp.allclose(out_bf16, ref_big, atol=5e-2, rtol=5e-2), \
        "bf16 gridded-batch mismatch vs JAX reference"

    print("KERNEL_OK")
</pallas_src>

<mosaic_0001>
module attributes {stable_mosaic.version = 11 : i64} {
  func.func @_mlp_kernel(%arg0: i32, %arg1: memref<8x8xf32, #tpu.memory_space<vmem>>, %arg2: memref<32x8xf32, #tpu.memory_space<vmem>>, %arg3: memref<32x1xf32, #tpu.memory_space<vmem>>, %arg4: memref<32x32xf32, #tpu.memory_space<vmem>>, %arg5: memref<32x1xf32, #tpu.memory_space<vmem>>, %arg6: memref<8x32xf32, #tpu.memory_space<vmem>>, %arg7: memref<8x1xf32, #tpu.memory_space<vmem>>, %arg8: memref<8x8xf32, #tpu.memory_space<vmem>>) attributes {dimension_semantics = [#tpu.dimension_semantics<parallel>], iteration_bounds = array<i64: 1>, scalar_prefetch = 0 : i64, scratch_operands = 0 : i64, tpu.core_type = #tpu.core_type<tc>, window_params = [{transform_indices = @transform_0, window_bounds = array<i64: 8, 8>}, {pipeline_mode = #tpu.pipeline_mode<synchronous>, transform_indices = @transform_1, window_bounds = array<i64: 32, 8>}, {pipeline_mode = #tpu.pipeline_mode<synchronous>, transform_indices = @transform_2, window_bounds = array<i64: 32, 1>}, {pipeline_mode = #tpu.pipeline_mode<synchronous>, transform_indices = @transform_3, window_bounds = array<i64: 32, 32>}, {pipeline_mode = #tpu.pipeline_mode<synchronous>, transform_indices = @transform_4, window_bounds = array<i64: 32, 1>}, {pipeline_mode = #tpu.pipeline_mode<synchronous>, transform_indices = @transform_5, window_bounds = array<i64: 8, 32>}, {pipeline_mode = #tpu.pipeline_mode<synchronous>, transform_indices = @transform_6, window_bounds = array<i64: 8, 1>}, {transform_indices = @transform_7, window_bounds = array<i64: 8, 8>}]} {
    %c0 = arith.constant 0 : index
    %c0_0 = arith.constant 0 : index
    %0 = vector.load %arg1[%c0, %c0_0] : memref<8x8xf32, #tpu.memory_space<vmem>>, vector<8x8xf32>
    %c0_1 = arith.constant 0 : index
    %c0_2 = arith.constant 0 : index
    %1 = vector.load %arg2[%c0_1, %c0_2] : memref<32x8xf32, #tpu.memory_space<vmem>>, vector<32x8xf32>
    %cst = arith.constant dense<0.000000e+00> : vector<32x8xf32>
    %2 = tpu.matmul %1, %0, %cst {dimension_numbers = #tpu.dot_dimension_numbers<[1], [0], [0], [1], [0, 0, 1, 1], [], []>} : vector<32x8xf32>, vector<8x8xf32>, vector<32x8xf32> -> vector<32x8xf32>
    %c0_3 = arith.constant 0 : index
    %c0_4 = arith.constant 0 : index
    %3 = vector.load %arg3[%c0_3, %c0_4] : memref<32x1xf32, #tpu.memory_space<vmem>>, vector<32x1xf32>
    %4 = vector.broadcast %3 : vector<32x1xf32> to vector<32x8xf32>
    %5 = arith.addf %2, %4 : vector<32x8xf32>
    %cst_5 = arith.constant 0.000000e+00 : f32
    %6 = vector.broadcast %cst_5 : f32 to vector<32x8xf32>
    %7 = arith.maximumf %5, %6 : vector<32x8xf32>
    %c0_6 = arith.constant 0 : index
    %c0_7 = arith.constant 0 : index
    %8 = vector.load %arg4[%c0_6, %c0_7] : memref<32x32xf32, #tpu.memory_space<vmem>>, vector<32x32xf32>
    %cst_8 = arith.constant dense<0.000000e+00> : vector<32x8xf32>
    %9 = tpu.matmul %8, %7, %cst_8 {dimension_numbers = #tpu.dot_dimension_numbers<[1], [0], [0], [1], [0, 0, 1, 1], [], []>} : vector<32x32xf32>, vector<32x8xf32>, vector<32x8xf32> -> vector<32x8xf32>
    %c0_9 = arith.constant 0 : index
    %c0_10 = arith.constant 0 : index
    %10 = vector.load %arg5[%c0_9, %c0_10] : memref<32x1xf32, #tpu.memory_space<vmem>>, vector<32x1xf32>
    %11 = vector.broadcast %10 : vector<32x1xf32> to vector<32x8xf32>
    %12 = arith.addf %9, %11 : vector<32x8xf32>
    %cst_11 = arith.constant 0.000000e+00 : f32
    %13 = vector.broadcast %cst_11 : f32 to vector<32x8xf32>
    %14 = arith.maximumf %12, %13 : vector<32x8xf32>
    %c0_12 = arith.constant 0 : index
    %c0_13 = arith.constant 0 : index
    %15 = vector.load %arg6[%c0_12, %c0_13] : memref<8x32xf32, #tpu.memory_space<vmem>>, vector<8x32xf32>
    %cst_14 = arith.constant dense<0.000000e+00> : vector<8x8xf32>
    %16 = tpu.matmul %15, %14, %cst_14 {dimension_numbers = #tpu.dot_dimension_numbers<[1], [0], [0], [1], [0, 0, 1, 1], [], []>} : vector<8x32xf32>, vector<32x8xf32>, vector<8x8xf32> -> vector<8x8xf32>
    %c0_15 = arith.constant 0 : index
    %c0_16 = arith.constant 0 : index
    %17 = vector.load %arg7[%c0_15, %c0_16] : memref<8x1xf32, #tpu.memory_space<vmem>>, vector<8x1xf32>
    %18 = vector.broadcast %17 : vector<8x1xf32> to vector<8x8xf32>
    %19 = arith.addf %16, %18 : vector<8x8xf32>
    %c0_17 = arith.constant 0 : index
    %c0_18 = arith.constant 0 : index
    %20 = vector.load %arg8[%c0_17, %c0_18] : memref<8x8xf32, #tpu.memory_space<vmem>>, vector<8x8xf32>
    tpu.vector_store %arg8[%c0_17, %c0_18], %19 {strides = array<i32>} : memref<8x8xf32, #tpu.memory_space<vmem>>, vector<8x8xf32>,
    return
  }
  func.func @transform_0(%arg0: i32) -> (i32, i32) {
    %c0_i32 = arith.constant 0 : i32
    %c0_i32_0 = arith.constant 0 : i32
    return %c0_i32, %arg0 : i32, i32
  }
  func.func @transform_1(%arg0: i32) -> (i32, i32) {
    %c0_i32 = arith.constant 0 : i32
    %c0_i32_0 = arith.constant 0 : i32
    %c0_i32_1 = arith.constant 0 : i32
    return %c0_i32, %c0_i32_0 : i32, i32
  }
  func.func @transform_2(%arg0: i32) -> (i32, i32) {
    %c0_i32 = arith.constant 0 : i32
    %c0_i32_0 = arith.constant 0 : i32
    %c0_i32_1 = arith.constant 0 : i32
    return %c0_i32, %c0_i32_0 : i32, i32
  }
  func.func @transform_3(%arg0: i32) -> (i32, i32) {
    %c0_i32 = arith.constant 0 : i32
    %c0_i32_0 = arith.constant 0 : i32
    %c0_i32_1 = arith.constant 0 : i32
    return %c0_i32, %c0_i32_0 : i32, i32
  }
  func.func @transform_4(%arg0: i32) -> (i32, i32) {
    %c0_i32 = arith.constant 0 : i32
    %c0_i32_0 = arith.constant 0 : i32
    %c0_i32_1 = arith.constant 0 : i32
    return %c0_i32, %c0_i32_0 : i32, i32
  }
  func.func @transform_5(%arg0: i32) -> (i32, i32) {
    %c0_i32 = arith.constant 0 : i32
    %c0_i32_0 = arith.constant 0 : i32
    %c0_i32_1 = arith.constant 0 : i32
    return %c0_i32, %c0_i32_0 : i32, i32
  }
  func.func @transform_6(%arg0: i32) -> (i32, i32) {
    %c0_i32 = arith.constant 0 : i32
    %c0_i32_0 = arith.constant 0 : i32
    %c0_i32_1 = arith.constant 0 : i32
    return %c0_i32, %c0_i32_0 : i32, i32
  }
  func.func @transform_7(%arg0: i32) -> (i32, i32) {
    %c0_i32 = arith.constant 0 : i32
    %c0_i32_0 = arith.constant 0 : i32
    return %c0_i32, %arg0 : i32, i32
  }
}

</mosaic_0001>

<bundles_post_ra>
// kernel: tpu_custom_call.1
= control target key start
LH: loop header
LB: loop body
LE: loop exit
PB: predicated region body
PF: predicated region fallthrough
CT: control target
= control target key end

     0   :  { %vm56_vm0 = vcmask 64512   ;;  %v268_v5 = vmov 0   ;;  %s380_s0 = inlined_call_operand.vmem [shape: f32[8,8], index: 0, kind: input, shape index: {}]   ;;  %s381_s1 = inlined_call_operand.vmem [shape: f32[32,8], index: 1, kind: input, shape index: {}]   ;;  %s382_s2 = inlined_call_operand.vmem [shape: f32[32,1], index: 2, kind: input, shape index: {}]   ;;  %s383_s3 = inlined_call_operand.vmem [shape: f32[32,32], index: 3, kind: input, shape index: {}]   ;;  %s384_s4 = inlined_call_operand.vmem [shape: f32[32,1], index: 4, kind: input, shape index: {}]   ;;  %s385_s5 = inlined_call_operand.vmem [shape: f32[8,32], index: 5, kind: input, shape index: {}]   ;;  %s386_s6 = inlined_call_operand.vmem [shape: f32[8,1], index: 6, kind: input, shape index: {}]   ;;  %s387_s7 = inlined_call_operand.hbm [shape: f32[8,8], index: 7, kind: output, shape index: {}]  }
   0x1   :  { %v27_v0 = vld [vmem:[%s380_s0] sm:$0xff]  ;;  %v31_v2 = vld [vmem:[%s381_s1 + $0x18] sm:$0xff]  ;;  %v33_v4 = vld [vmem:[%s382_s2 + $0x8] sm:$0xff]  ;;  %240 = vset.pattern.permute.xlu1 %v268_v5  ;;  %239 = vset.pattern.permute.xlu0 %v268_v5 }
   0x2   :  { %v28_v1 = vld [vmem:[%s381_s1] sm:$0xff]  ;;  %84 = vmatpush.msra.mxu0 %v27_v0  ;;  %232 = vmatpush.msra.mxu2 %v27_v0  ;;  %v35_v3 = vld [vmem:[%s382_s2 + $0x18] sm:$0xff] }
   0x3   :  { %223 = vmatmul.msk.f32.vlgmr.msra.gmra.mxu0 %vm56_vm0, %v28_v1  ;;  %226 = vmatmul.msk.f32.vlgmr.msra.gmra.mxu2 %vm56_vm0, %v31_v2 }
   0x4   :  { %12 = vsyncpa [#allocation3], 0  ;;  %53 = vperm.xlu0 %239, %v35_v3   ;;  %43 = vperm.xlu1 %240, %v33_v4   ;;  %v29_v6 = vld [vmem:[%s381_s1 + $0x8] sm:$0xff]  ;;  %v34_v7 = vld [vmem:[%s382_s2 + $0x10] sm:$0xff]  ;;  %vm130_vm1 = vcmask 261120   ;;  %s269_s10 = smov [#allocation2]  }
   0x5   :  { %241 = vset.pattern.permute.xlu2 %v268_v5  ;;  %v32_v8 = vld [vmem:[%s382_s2] sm:$0xff]  ;;  %v30_v9 = vld [vmem:[%s381_s1 + $0x10] sm:$0xff]  ;;  %v107_v10 = vld [vmem:[%s384_s4 + $0x8] sm:$0xff]  ;;  %s212_s0 = sshll.u32 %s269_s10, 4  ;;  %s214_s13 = sshll.u32 %s387_s7, 4  ;;  %s213_s0 = int_to_ptr.vmem [resolvable:$true] %s212_s0  ;;  %s215_s13 = int_to_ptr.hbm [resolvable:$true] %s214_s13 }
   0x6   :  { %v106_v11 = vld [vmem:[%s384_s4] sm:$0xff]  ;;  %v109_v13 = vld [vmem:[%s384_s4 + $0x18] sm:$0xff]  ;;  %v108_v19 = vld [vmem:[%s384_s4 + $0x10] sm:$0xff] }
   0x7   :  { %127 = vperm.xlu2 %241, %v109_v13   ;;  %v177_v24 = vld [vmem:[%s386_s6] sm:$0xff]  ;;  %v104_v32 = vld [vmem:[%s383_s3 + $0x10] sm:$0xff]  ;;  %v103_v33 = vld [vmem:[%s383_s3 + $0x8] sm:$0xff] }
   0x8   :  { %v102_v31 = vld [vmem:[%s383_s3] sm:$0xff]  ;;  %v105_v34 = vld [vmem:[%s383_s3 + $0x18] sm:$0xff] }
   0x9   :  { %v176_v51 = vld [vmem:[%s385_s5] sm:$0xff] }
   0xb   :  { %224 = vmatmul.msk.f32.gmra.mxu0 %vm56_vm0, %v29_v6 }
   0xc   :  { %48 = vperm.xlu0 %239, %v34_v7   ;;  %38 = vperm.xlu1 %240, %v32_v8  }
   0xf   :  { %122 = vperm.xlu2 %241, %v108_v19  }
  0x13   :  { %225 = vmatmul.msk.f32.gmra.mxu0 %vm56_vm0, %v30_v9 }
  0x14   :  { %117 = vperm.xlu0 %239, %v107_v10   ;;  %112 = vperm.xlu1 %240, %v106_v11  }
  0x17   :  { %180 = vperm.xlu2 %241, %v177_v24  }
  0x61   :  { %v128_v35 = vpop.permute.xlu2 %127 }
  0x69   :  { %v123_v38 = vpop.permute.xlu2 %122 }
  0x71   :  { %v181_v52 = vpop.permute.xlu2 %180 }
  0x76   :  { %v54_v14 = vpop.permute.xlu0 %53  ;;  %v44_v15 = vpop.permute.xlu1 %43 }
  0x7e   :  { %v49_v21 = vpop.permute.xlu0 %48  ;;  %v39_v22 = vpop.permute.xlu1 %38 }
  0x80   :  { %v86_v12 = vpop.f32.mrf.mxu0 }
  0x81   :  { %v87_v27 = vadd.f32 %v86_v12, %v39_v22 }
  0x83   :  { %v98_v30 = vmax.f32 %v87_v27, 0.0 }
  0x86   :  { %v95_v16 = vpop.f32.mrf.mxu2  ;;  %v118_v43 = vpop.permute.xlu0 %117 }
  0x87   :  { %v96_v18 = vadd.f32 %v95_v16, %v54_v14  ;;  %v113_v46 = vpop.permute.xlu1 %112 }
  0x88   :  { %v89_v17 = vpop.f32.mrf.mxu0 }
  0x89   :  { %v101_v20 = vmax.f32 %v96_v18, 0.0  ;;  %v90_v25 = vadd.f32 %v89_v17, %v44_v15 }
  0x8b   :  { %155 = vmatpush.msra.mxu1 %v101_v20  ;;  %233 = vmatpush.msra.mxu3 %v101_v20  ;;  %v99_v29 = vmax.f32 %v90_v25, 0.0 }
  0x90   :  { %v92_v23 = vpop.f32.mrf.mxu0 }
  0x91   :  { %v93_v26 = vadd.f32 %v92_v23, %v49_v21 }
  0x93   :  { %v100_v28 = vmax.f32 %v93_v26, 0.0 }
  0x95   :  { %156 = vmatpush.msra.mxu1 %v100_v28  ;;  %234 = vmatpush.msra.mxu3 %v100_v28 }
  0x97   :  { %157 = vmatpush.msra.mxu1 %v99_v29  ;;  %235 = vmatpush.msra.mxu3 %v99_v29 }
  0x99   :  { %158 = vmatpush.msra.mxu1 %v98_v30  ;;  %236 = vmatpush.msra.mxu3 %v98_v30 }
  0x9a   :  { %227 = vmatmul.msk.f32.vlgmr.msra.gmra.mxu1 %vm130_vm1, %v102_v31  ;;  %229 = vmatmul.msk.f32.vlgmr.msra.gmra.mxu3 %vm130_vm1, %v104_v32 }
  0xa2   :  { %228 = vmatmul.msk.f32.gmra.mxu1 %vm130_vm1, %v103_v33  ;;  %230 = vmatmul.msk.f32.gmra.mxu3 %vm130_vm1, %v105_v34 }
 0x117   :  { %v160_v36 = vpop.f32.mrf.mxu1 }
 0x118   :  { %v161_v47 = vadd.f32 %v160_v36, %v113_v46 }
 0x11a   :  { %v172_v50 = vmax.f32 %v161_v47, 0.0 }
 0x11d   :  { %v166_v37 = vpop.f32.mrf.mxu3 }
 0x11e   :  { %v167_v41 = vadd.f32 %v166_v37, %v123_v38 }
 0x11f   :  { %v163_v39 = vpop.f32.mrf.mxu1 }
 0x120   :  { %v164_v44 = vadd.f32 %v163_v39, %v118_v43  ;;  %v174_v48 = vmax.f32 %v167_v41, 0.0 }
 0x122   :  { %v173_v49 = vmax.f32 %v164_v44, 0.0 }
 0x125   :  { %v169_v40 = vpop.f32.mrf.mxu3 }
 0x126   :  { %v170_v42 = vadd.f32 %v169_v40, %v128_v35 }
 0x128   :  { %v175_v45 = vmax.f32 %v170_v42, 0.0 }
 0x12a   :  { %198 = vmatpush.msrb.mxu2 %v175_v45 }
 0x12c   :  { %199 = vmatpush.msrb.mxu2 %v174_v48 }
 0x12e   :  { %200 = vmatpush.msrb.mxu2 %v173_v49 }
 0x130   :  { %201 = vmatpush.msrb.mxu2 %v172_v50 }
 0x131   :  { %231 = vmatmul.msk.f32.vlgmr.msrb.gmra.mxu2 %vm130_vm1, %v176_v51 }
 0x1b4   :  { %v203_v53 = vpop.f32.mrf.mxu2 }
 0x1b5   :  { %v204_v54 = vadd.f32 %v203_v53, %v181_v52 }
 0x1b7   :  { %206 = vst.msk [vmem:[#allocation2] sm:$0xff] %vm56_vm0, %v204_v54 }
 0x1b8   :  { %217 = dma.vmem_to_hbm [thread:$0]  %s213_s0, 128, %s215_s13, [#allocation3]  }
 0x1b9   :  { %266 = dma.done.wait [#allocation3], 128  }
 0x1ba   :  { %267 = vsyncadd [#allocation3], 4294967168 }
 0x1bb   :  { %222 = vsyncpa [#allocation3], 1 }

</bundles_post_ra>
